<compile_context>
chip_gen: v7x
topology: tpu7x:2x2x1
jax: 0.10.0
libtpu: 0.0.40
codegen_flags: <defaults>
</compile_context>

<pallas_src>
import jax
import jax.numpy as jnp
from jax.experimental import pallas as pl
from jax.experimental.pallas import tpu as pltpu

IN_FEATURES = 32 * 4 * 4   # 512
HIDDEN = 512
OUT_FEATURES = 8
OUT_PAD = 128              # lane-dense output width


def _round_up(x, m):
    return (x + m - 1) // m * m


def mlp_kernel(x_ref, w1_ref, b1_ref, w2_ref, b2_ref, o_ref):
    # Cast x to bf16 in-kernel (VPU has slack next to the MXU); fc1 on the MXU,
    # f32 accumulation.
    xb = x_ref[...].astype(jnp.bfloat16)
    h = jnp.dot(xb, w1_ref[...], preferred_element_type=jnp.float32)
    # bias + ReLU in f32 on the VPU (v5e has no bf16 VPU path)
    h = jnp.maximum(h + b1_ref[...], 0.0)
    # dropout: identity in eval mode (no masking, no scaling)
    # TODO(synk): training-mode dropout (pltpu.prng_random_bits mask + 1/(1-p) scale) not implemented
    # fc2 on the MXU: cast activations to bf16 right before the dot, f32 accumulate
    y = jnp.dot(h.astype(jnp.bfloat16), w2_ref[...], preferred_element_type=jnp.float32)
    o_ref[...] = (y + b2_ref[...]).astype(o_ref.dtype)


def prepare_params(w1, b1, w2, b2):
    """One-time (per-weight-update) conversion: bf16 weights, fc2 padded to 128 lanes."""
    w1b = w1.astype(jnp.bfloat16)
    b1f = b1.astype(jnp.float32).reshape(1, HIDDEN)
    w2p = jnp.zeros((HIDDEN, OUT_PAD), jnp.bfloat16).at[:, :OUT_FEATURES].set(
        w2.astype(jnp.bfloat16))
    b2p = jnp.zeros((1, OUT_PAD), jnp.float32).at[:, :OUT_FEATURES].set(
        b2.astype(jnp.float32).reshape(1, OUT_FEATURES))
    return w1b, b1f, w2p, b2p


def _choose_tm(B, block_m):
    """Pick batch-tile size: as large as block_m allows, 16-aligned, and — when the
    batch is big enough — small enough that the grid has >= 2 steps (both v7x TCs)."""
    b_aligned = _round_up(B, 16)
    tm = min(block_m, b_aligned)
    if b_aligned >= 32:
        # ensure at least two grid iterations so the "parallel" axis feeds both
        # TensorCores on v7x (harmless elsewhere)
        tm = min(tm, _round_up(pl.cdiv(b_aligned, 2), 16))
    return max(tm, 16)


def mlp_forward(x, params, *, block_m=1024):
    """x:(B,512) f32; params = prepare_params(w1,b1,w2,b2). Returns (B,8) f32."""
    w1b, b1f, w2p, b2p = params
    B = x.shape[0]

    tm = _choose_tm(B, block_m)
    Bp = _round_up(B, tm)
    if Bp != B:
        x = jnp.pad(x, ((0, Bp - B), (0, 0)))

    out_padded = pl.pallas_call(
        mlp_kernel,
        out_shape=jax.ShapeDtypeStruct((Bp, OUT_PAD), jnp.float32),
        grid=(Bp // tm,),
        in_specs=[
            pl.BlockSpec((tm, IN_FEATURES), lambda i: (i, 0)),       # x tile per step (f32)
            pl.BlockSpec((IN_FEATURES, HIDDEN), lambda i: (0, 0)),   # W1 resident (bf16)
            pl.BlockSpec((1, HIDDEN), lambda i: (0, 0)),             # b1 resident (f32)
            pl.BlockSpec((HIDDEN, OUT_PAD), lambda i: (0, 0)),       # W2 padded resident (bf16)
            pl.BlockSpec((1, OUT_PAD), lambda i: (0, 0)),            # b2 padded resident (f32)
        ],
        out_specs=pl.BlockSpec((tm, OUT_PAD), lambda i: (i, 0)),
        compiler_params=pltpu.CompilerParams(
            dimension_semantics=("parallel",),   # shard batch tiles across TCs on v7x
        ),
    )(x, w1b, b1f, w2p, b2p)

    return out_padded[:B, :OUT_FEATURES]


def init_params(key, dtype=jnp.float32):
    # Deterministic init mimicking PyTorch Linear's U(-1/sqrt(fan_in), 1/sqrt(fan_in))
    k1, k2, k3, k4 = jax.random.split(key, 4)
    bound1 = 1.0 / (IN_FEATURES ** 0.5)
    bound2 = 1.0 / (HIDDEN ** 0.5)
    w1 = jax.random.uniform(k1, (IN_FEATURES, HIDDEN), dtype, -bound1, bound1)
    b1 = jax.random.uniform(k2, (1, HIDDEN), dtype, -bound1, bound1)
    w2 = jax.random.uniform(k3, (HIDDEN, OUT_FEATURES), dtype, -bound2, bound2)
    b2 = jax.random.uniform(k4, (1, OUT_FEATURES), dtype, -bound2, bound2)
    return w1, b1, w2, b2


if __name__ == "__main__":
    key = jax.random.PRNGKey(0)
    kx, kp = jax.random.split(key)
    B = 8
    x = jax.random.normal(kx, (B, IN_FEATURES), jnp.float32)
    w1, b1, w2, b2 = init_params(kp)

    # Hoisted once: bf16 weights + lane-dense padded fc2 params.
    params = prepare_params(w1, b1, w2, b2)

    out = mlp_forward(x, params)
    out = jax.block_until_ready(out)

    # Reference in plain f32 JAX (eval-mode dropout == identity).
    # Tolerance loosened for the bf16 MXU path (f32 accumulation keeps error small).
    ref = jnp.maximum(x @ w1 + b1, 0.0) @ w2 + b2
    assert out.shape == (B, OUT_FEATURES)
    assert jnp.allclose(out, ref, atol=5e-2, rtol=5e-2), (
        float(jnp.max(jnp.abs(out - ref))))

    print("KERNEL_OK")
</pallas_src>

<mosaic_0001>
module attributes {stable_mosaic.version = 11 : i64} {
  func.func @mlp_kernel(%arg0: i32, %arg1: memref<16x512xf32, #tpu.memory_space<vmem>>, %arg2: memref<512x512xbf16, #tpu.memory_space<vmem>>, %arg3: memref<1x512xf32, #tpu.memory_space<vmem>>, %arg4: memref<512x128xbf16, #tpu.memory_space<vmem>>, %arg5: memref<1x128xf32, #tpu.memory_space<vmem>>, %arg6: memref<16x128xf32, #tpu.memory_space<vmem>>) attributes {dimension_semantics = [#tpu.dimension_semantics<parallel>], iteration_bounds = array<i64: 1>, scalar_prefetch = 0 : i64, scratch_operands = 0 : i64, tpu.core_type = #tpu.core_type<tc>, window_params = [{transform_indices = @transform_0, window_bounds = array<i64: 16, 512>}, {pipeline_mode = #tpu.pipeline_mode<synchronous>, transform_indices = @transform_1, window_bounds = array<i64: 512, 512>}, {pipeline_mode = #tpu.pipeline_mode<synchronous>, transform_indices = @transform_2, window_bounds = array<i64: 1, 512>}, {pipeline_mode = #tpu.pipeline_mode<synchronous>, transform_indices = @transform_3, window_bounds = array<i64: 512, 128>}, {pipeline_mode = #tpu.pipeline_mode<synchronous>, transform_indices = @transform_4, window_bounds = array<i64: 1, 128>}, {transform_indices = @transform_5, window_bounds = array<i64: 16, 128>}]} {
    %c0 = arith.constant 0 : index
    %c0_0 = arith.constant 0 : index
    %0 = vector.load %arg1[%c0, %c0_0] : memref<16x512xf32, #tpu.memory_space<vmem>>, vector<16x512xf32>
    %1 = arith.truncf %0 : vector<16x512xf32> to vector<16x512xbf16>
    %c0_1 = arith.constant 0 : index
    %c0_2 = arith.constant 0 : index
    %2 = vector.load %arg2[%c0_1, %c0_2] : memref<512x512xbf16, #tpu.memory_space<vmem>>, vector<512x512xbf16>
    %cst = arith.constant dense<0.000000e+00> : vector<16x512xf32>
    %3 = tpu.matmul %1, %2, %cst {dimension_numbers = #tpu.dot_dimension_numbers<[1], [0], [0], [1], [0, 0, 1, 1], [], []>} : vector<16x512xbf16>, vector<512x512xbf16>, vector<16x512xf32> -> vector<16x512xf32>
    %c0_3 = arith.constant 0 : index
    %c0_4 = arith.constant 0 : index
    %4 = vector.load %arg3[%c0_3, %c0_4] : memref<1x512xf32, #tpu.memory_space<vmem>>, vector<1x512xf32>
    %5 = vector.broadcast %4 : vector<1x512xf32> to vector<16x512xf32>
    %6 = arith.addf %3, %5 : vector<16x512xf32>
    %cst_5 = arith.constant 0.000000e+00 : f32
    %7 = vector.broadcast %cst_5 : f32 to vector<16x512xf32>
    %8 = arith.maximumf %6, %7 : vector<16x512xf32>
    %9 = arith.truncf %8 : vector<16x512xf32> to vector<16x512xbf16>
    %c0_6 = arith.constant 0 : index
    %c0_7 = arith.constant 0 : index
    %10 = vector.load %arg4[%c0_6, %c0_7] : memref<512x128xbf16, #tpu.memory_space<vmem>>, vector<512x128xbf16>
    %cst_8 = arith.constant dense<0.000000e+00> : vector<16x128xf32>
    %11 = tpu.matmul %9, %10, %cst_8 {dimension_numbers = #tpu.dot_dimension_numbers<[1], [0], [0], [1], [0, 0, 1, 1], [], []>} : vector<16x512xbf16>, vector<512x128xbf16>, vector<16x128xf32> -> vector<16x128xf32>
    %c0_9 = arith.constant 0 : index
    %c0_10 = arith.constant 0 : index
    %12 = vector.load %arg5[%c0_9, %c0_10] : memref<1x128xf32, #tpu.memory_space<vmem>>, vector<1x128xf32>
    %13 = vector.broadcast %12 : vector<1x128xf32> to vector<16x128xf32>
    %14 = arith.addf %11, %13 : vector<16x128xf32>
    %c0_11 = arith.constant 0 : index
    %c0_12 = arith.constant 0 : index
    %15 = vector.load %arg6[%c0_11, %c0_12] : memref<16x128xf32, #tpu.memory_space<vmem>>, vector<16x128xf32>
    tpu.vector_store %arg6[%c0_11, %c0_12], %14 {strides = array<i32>} : memref<16x128xf32, #tpu.memory_space<vmem>>, vector<16x128xf32>,
    return
  }
  func.func @transform_0(%arg0: i32) -> (i32, i32) {
    %c0_i32 = arith.constant 0 : i32
    %c0_i32_0 = arith.constant 0 : i32
    return %arg0, %c0_i32 : i32, i32
  }
  func.func @transform_1(%arg0: i32) -> (i32, i32) {
    %c0_i32 = arith.constant 0 : i32
    %c0_i32_0 = arith.constant 0 : i32
    %c0_i32_1 = arith.constant 0 : i32
    return %c0_i32, %c0_i32_0 : i32, i32
  }
  func.func @transform_2(%arg0: i32) -> (i32, i32) {
    %c0_i32 = arith.constant 0 : i32
    %c0_i32_0 = arith.constant 0 : i32
    %c0_i32_1 = arith.constant 0 : i32
    return %c0_i32, %c0_i32_0 : i32, i32
  }
  func.func @transform_3(%arg0: i32) -> (i32, i32) {
    %c0_i32 = arith.constant 0 : i32
    %c0_i32_0 = arith.constant 0 : i32
    %c0_i32_1 = arith.constant 0 : i32
    return %c0_i32, %c0_i32_0 : i32, i32
  }
  func.func @transform_4(%arg0: i32) -> (i32, i32) {
    %c0_i32 = arith.constant 0 : i32
    %c0_i32_0 = arith.constant 0 : i32
    %c0_i32_1 = arith.constant 0 : i32
    return %c0_i32, %c0_i32_0 : i32, i32
  }
  func.func @transform_5(%arg0: i32) -> (i32, i32) {
    %c0_i32 = arith.constant 0 : i32
    %c0_i32_0 = arith.constant 0 : i32
    return %arg0, %c0_i32 : i32, i32
  }
}

</mosaic_0001>

<bundles_post_ra>
// kernel: tpu_custom_call.1
= control target key start
LH: loop header
LB: loop body
LE: loop exit
PB: predicated region body
PF: predicated region fallthrough
CT: control target
= control target key end

     0   :  { %10 = vsyncpa [#allocation3], 0  ;;  %s2061_s0 = inlined_call_operand.hbm [shape: f32[16,512], index: 0, kind: input, shape index: {}]   ;;  %s2062_s1 = inlined_call_operand.hbm [shape: bf16[512,512], index: 1, kind: input, shape index: {}]   ;;  %s2063_s2 = inlined_call_operand.vmem [shape: f32[1,512], index: 2, kind: input, shape index: {}]   ;;  %s2064_s3 = inlined_call_operand.hbm [shape: bf16[512,128], index: 3, kind: input, shape index: {}]   ;;  %s2065_s4 = inlined_call_operand.vmem [shape: f32[1,128], index: 4, kind: input, shape index: {}]   ;;  %s2066_s5 = inlined_call_operand.hbm [shape: f32[16,128], index: 5, kind: output, shape index: {}]  }
   0x1   :  { %11 = vsyncpa [#allocation6], 0 }
   0x2   :  { %12 = vsyncpa [#allocation4], 0  ;;  %s1965_s18 = smov [#allocation5]   ;;  %s1871_s22 = scalar_lea.hbm %s2062_s1, 16384 }
   0x3   :  { %s30_s19 = sshll.u32 %s1965_s18, 4  ;;  %p1872_p0 = scmp.ne.s32.totalorder %s2062_s1, %s1871_s22  ;;  %s31_s19 = int_to_ptr.vmem [resolvable:$true] %s30_s19 }
   0x4   :  { %p1875_p1 = scmp.lt.u32.totalorder %s1871_s22, %s2062_s1 }
   0x6   :  { %p1877_p2 = pnand %p1875_p1, %p1872_p0 }
   0x8   :  { %1880 = shalt.err (!%p1877_p2)
}
   0x9   :  { %s1881_s27 = scalar_lea.vmem %s31_s19, 16384  ;;  %p1886_p4 = scmp.lt.s32.totalorder %s31_s19, %s31_s19 }
   0xa   :  { %p1882_p3 = scmp.ne.s32.totalorder %s31_s19, %s1881_s27  ;;  %p1887_p5 = scmp.lt.s32.totalorder %s1881_s27, %s1881_s27 }
   0xc   :  { %p1888_p6 = por %p1887_p5, %p1886_p4 }
   0xe   :  { %p1889_p7 = pnand %p1888_p6, %p1882_p3 }
  0x10   :  { %1892 = shalt.err (!%p1889_p7)
}
  0x11   :  { %s1966_s28 = smov 256   ;;  %s1967_s29 = smov 16  }
  0x12   :  { %36 = dma.hbm_to_vmem [thread:$0]  %s2062_s1, 16384, %s31_s19, [#allocation6], %s1966_s28, %s1966_s28, %s1967_s29  }
  0x13   :  { %s1968_s7 = smov [#allocation2]   ;;  %s1893_s11 = scalar_lea.hbm %s2061_s0, 1024 }
  0x14   :  { %s18_s8 = sshll.u32 %s1968_s7, 4  ;;  %p1894_p8 = scmp.ne.s32.totalorder %s2061_s0, %s1893_s11  ;;  %s19_s8 = int_to_ptr.vmem [resolvable:$true] %s18_s8 }
  0x15   :  { %p1897_p9 = scmp.lt.u32.totalorder %s1893_s11, %s2061_s0 }
  0x17   :  { %p1899_p10 = pnand %p1897_p9, %p1894_p8 }
  0x19   :  { %1902 = shalt.err (!%p1899_p10)
}
  0x1a   :  { %s1903_s16 = scalar_lea.vmem %s19_s8, 1024  ;;  %p1908_p12 = scmp.lt.s32.totalorder %s19_s8, %s19_s8 }
  0x1b   :  { %p1904_p11 = scmp.ne.s32.totalorder %s19_s8, %s1903_s16  ;;  %p1909_p13 = scmp.lt.s32.totalorder %s1903_s16, %s1903_s16 }
  0x1d   :  { %p1910_p0 = por %p1909_p13, %p1908_p12 }
  0x1f   :  { %p1911_p1 = pnand %p1910_p0, %p1904_p11 }
  0x21   :  { %1914 = shalt.err (!%p1911_p1)
}
  0x22   :  { %s1969_s1 = smov 512   ;;  %s1970_s17 = smov 32  }
  0x23   :  { %24 = dma.hbm_to_vmem [thread:$0]  %s2061_s0, 1024, %s19_s8, [#allocation3], %s1969_s1, %s1969_s1, %s1970_s17  }
  0x24   :  { %s1971_s20 = smov [#allocation7]   ;;  %s1915_s24 = scalar_lea.hbm %s2064_s3, 4096 }
  0x25   :  { %s44_s21 = sshll.u32 %s1971_s20, 4  ;;  %p1916_p2 = scmp.ne.s32.totalorder %s2064_s3, %s1915_s24  ;;  %s45_s21 = int_to_ptr.vmem [resolvable:$true] %s44_s21 }
  0x26   :  { %p1919_p3 = scmp.lt.u32.totalorder %s1915_s24, %s2064_s3 }
  0x28   :  { %p1921_p4 = pnand %p1919_p3, %p1916_p2 }
  0x2a   :  { %1924 = shalt.err (!%p1921_p4)
}
  0x2b   :  { %s1925_s29 = scalar_lea.vmem %s45_s21, 4096  ;;  %p1930_p6 = scmp.lt.s32.totalorder %s45_s21, %s45_s21 }
  0x2c   :  { %p1926_p5 = scmp.ne.s32.totalorder %s45_s21, %s1925_s29  ;;  %p1931_p7 = scmp.lt.s32.totalorder %s1925_s29, %s1925_s29 }
  0x2e   :  { %p1932_p8 = por %p1931_p7, %p1930_p6 }
  0x30   :  { %p1933_p9 = pnand %p1932_p8, %p1926_p5 }
  0x32   :  { %1936 = shalt.err (!%p1933_p9)
}
  0x33   :  { %s1972_s0 = smov 64   ;;  %s1973_s30 = smov 4  }
  0x34   :  { %50 = dma.hbm_to_vmem [thread:$0]  %s2064_s3, 4096, %s45_s21, [#allocation6], %s1972_s0, %s1972_s0, %s1973_s30  }
  0x35   :  { %1959 = dma.done.wait [#allocation3], 1024  }
  0x36   :  { %1960 = vsyncadd [#allocation3], 4294966272 }
  0x37   :  { %1961 = dma.done.wait [#allocation6], 20480  }
  0x38   :  { %1962 = vsyncadd [#allocation6], 4294946816  ;;  %v1647_v0 = vld [vmem:[#allocation5 + $0x4] ss:$16 sps:$4 sm:$0xff]   ;;  %v1649_v1 = vld [vmem:[#allocation5 + $0xc] ss:$16 sps:$4 sm:$0xff]  }
  0x39   :  { %865 = vmatprep.subr.bf16.mxu0 %v1647_v0  ;;  %v1651_v2 = vld [vmem:[#allocation5] ss:$16 sps:$4 sm:$0xff]   ;;  %v1652_v3 = vld [vmem:[#allocation5 + $0x8] ss:$16 sps:$4 sm:$0xff]   ;;  %951 = vmatprep.subr.bf16.mxu1 %v1649_v1  ;;  %v1653_v4 = vld [vmem:[#allocation5 + $0x24] ss:$16 sps:$4 sm:$0xff]  }
  0x3a   :  { %866 = vmatpush1.bf16.msra.mxu0 %v1651_v2  ;;  %952 = vmatpush1.bf16.msra.mxu1 %v1652_v3  ;;  %v1655_v5 = vld [vmem:[#allocation5 + $0x2c] ss:$16 sps:$4 sm:$0xff]   ;;  %v1657_v6 = vld [vmem:[#allocation5 + $0x20] ss:$16 sps:$4 sm:$0xff]   ;;  %v1658_v7 = vld [vmem:[#allocation5 + $0x28] ss:$16 sps:$4 sm:$0xff]  }
  0x3b   :  { %867 = vmatprep.subr.bf16.mxu0 %v1653_v4  ;;  %953 = vmatprep.subr.bf16.mxu1 %v1655_v5  ;;  %v1659_v8 = vld [vmem:[#allocation5 + $0x44] ss:$16 sps:$4 sm:$0xff]   ;;  %v1661_v9 = vld [vmem:[#allocation5 + $0x4c] ss:$16 sps:$4 sm:$0xff]   ;;  %v1663_v10 = vld [vmem:[#allocation5 + $0x40] ss:$16 sps:$4 sm:$0xff]  }
  0x3c   :  { %v1664_v11 = vld [vmem:[#allocation5 + $0x48] ss:$16 sps:$4 sm:$0xff]   ;;  %v1665_v12 = vld [vmem:[#allocation5 + $0x64] ss:$16 sps:$4 sm:$0xff]   ;;  %v1667_v13 = vld [vmem:[#allocation5 + $0x6c] ss:$16 sps:$4 sm:$0xff]  }
  0x3d   :  { %v1669_v14 = vld [vmem:[#allocation5 + $0x60] ss:$16 sps:$4 sm:$0xff]   ;;  %v1670_v15 = vld [vmem:[#allocation5 + $0x68] ss:$16 sps:$4 sm:$0xff]   ;;  %v1671_v16 = vld [vmem:[#allocation5 + $0x84] ss:$16 sps:$4 sm:$0xff]  }
  0x3e   :  { %868 = vmatpush1.bf16.msra.mxu0 %v1657_v6  ;;  %954 = vmatpush1.bf16.msra.mxu1 %v1658_v7  ;;  %v1673_v17 = vld [vmem:[#allocation5 + $0x8c] ss:$16 sps:$4 sm:$0xff]   ;;  %v1675_v18 = vld [vmem:[#allocation5 + $0x80] ss:$16 sps:$4 sm:$0xff]   ;;  %v1676_v19 = vld [vmem:[#allocation5 + $0x88] ss:$16 sps:$4 sm:$0xff]  }
  0x3f   :  { %869 = vmatprep.subr.bf16.mxu0 %v1659_v8  ;;  %955 = vmatprep.subr.bf16.mxu1 %v1661_v9  ;;  %v1677_v20 = vld [vmem:[#allocation5 + $0xa4] ss:$16 sps:$4 sm:$0xff]   ;;  %v1679_v21 = vld [vmem:[#allocation5 + $0xac] ss:$16 sps:$4 sm:$0xff]   ;;  %v1681_v22 = vld [vmem:[#allocation5 + $0xa0] ss:$16 sps:$4 sm:$0xff]  }
  0x40   :  { %v1682_v23 = vld [vmem:[#allocation5 + $0xa8] ss:$16 sps:$4 sm:$0xff]   ;;  %v1683_v24 = vld [vmem:[#allocation5 + $0xc4] ss:$16 sps:$4 sm:$0xff]   ;;  %v1685_v25 = vld [vmem:[#allocation5 + $0xcc] ss:$16 sps:$4 sm:$0xff]  }
  0x41   :  { %v1687_v26 = vld [vmem:[#allocation5 + $0xc0] ss:$16 sps:$4 sm:$0xff]   ;;  %v1688_v27 = vld [vmem:[#allocation5 + $0xc8] ss:$16 sps:$4 sm:$0xff]   ;;  %v1689_v28 = vld [vmem:[#allocation5 + $0xe4] ss:$16 sps:$4 sm:$0xff]  }
  0x42   :  { %870 = vmatpush1.bf16.msra.mxu0 %v1663_v10  ;;  %956 = vmatpush1.bf16.msra.mxu1 %v1664_v11  ;;  %v1691_v29 = vld [vmem:[#allocation5 + $0xec] ss:$16 sps:$4 sm:$0xff]   ;;  %v1693_v30 = vld [vmem:[#allocation5 + $0xe0] ss:$16 sps:$4 sm:$0xff]   ;;  %v1694_v31 = vld [vmem:[#allocation5 + $0xe8] ss:$16 sps:$4 sm:$0xff]  }
  0x43   :  { %871 = vmatprep.subr.bf16.mxu0 %v1665_v12  ;;  %957 = vmatprep.subr.bf16.mxu1 %v1667_v13  ;;  %v1695_v32 = vld [vmem:[#allocation5 + $0x104] ss:$16 sps:$4 sm:$0xff]   ;;  %v1697_v33 = vld [vmem:[#allocation5 + $0x10c] ss:$16 sps:$4 sm:$0xff]   ;;  %v1699_v34 = vld [vmem:[#allocation5 + $0x100] ss:$16 sps:$4 sm:$0xff]  }
  0x44   :  { %v1700_v35 = vld [vmem:[#allocation5 + $0x108] ss:$16 sps:$4 sm:$0xff]   ;;  %v1701_v36 = vld [vmem:[#allocation5 + $0x124] ss:$16 sps:$4 sm:$0xff]   ;;  %v1703_v37 = vld [vmem:[#allocation5 + $0x12c] ss:$16 sps:$4 sm:$0xff]  }
  0x45   :  { %v1705_v38 = vld [vmem:[#allocation5 + $0x120] ss:$16 sps:$4 sm:$0xff]   ;;  %v1706_v39 = vld [vmem:[#allocation5 + $0x128] ss:$16 sps:$4 sm:$0xff]   ;;  %v1707_v40 = vld [vmem:[#allocation5 + $0x144] ss:$16 sps:$4 sm:$0xff]  }
  0x46   :  { %872 = vmatpush1.bf16.msra.mxu0 %v1669_v14  ;;  %958 = vmatpush1.bf16.msra.mxu1 %v1670_v15  ;;  %v1709_v41 = vld [vmem:[#allocation5 + $0x14c] ss:$16 sps:$4 sm:$0xff]   ;;  %v1711_v42 = vld [vmem:[#allocation5 + $0x140] ss:$16 sps:$4 sm:$0xff]   ;;  %v1712_v43 = vld [vmem:[#allocation5 + $0x148] ss:$16 sps:$4 sm:$0xff]  }
  0x47   :  { %873 = vmatprep.subr.bf16.mxu0 %v1671_v16  ;;  %959 = vmatprep.subr.bf16.mxu1 %v1673_v17  ;;  %v1713_v44 = vld [vmem:[#allocation5 + $0x164] ss:$16 sps:$4 sm:$0xff]   ;;  %v1715_v45 = vld [vmem:[#allocation5 + $0x16c] ss:$16 sps:$4 sm:$0xff]   ;;  %v1717_v48 = vld [vmem:[#allocation5 + $0x160] ss:$16 sps:$4 sm:$0xff]  }
  0x48   :  { %v64_v46 = vld [vmem:[#allocation2 + $0x8] sm:$0xff]  ;;  %v1719_v51 = vld [vmem:[#allocation5 + $0x184] ss:$16 sps:$4 sm:$0xff]   ;;  %v1723_v53 = vld [vmem:[#allocation5 + $0x180] ss:$16 sps:$4 sm:$0xff]   ;;  %s1974_s10 = smov [#allocation8]  }
  0x49   :  { %v68_v47 = vld [vmem:[#allocation2 + $0x28] sm:$0xff]  ;;  %v1725_v55 = vld [vmem:[#allocation5 + $0x1a4] ss:$16 sps:$4 sm:$0xff]   ;;  %v1729_v57 = vld [vmem:[#allocation5 + $0x1a0] ss:$16 sps:$4 sm:$0xff]   ;;  %s1401_s11 = sshll.u32 %s1974_s10, 4  ;;  %s1402_s11 = int_to_ptr.vmem [resolvable:$true] %s1401_s11 }
  0x4a   :  { %874 = vmatpush1.bf16.msra.mxu0 %v1675_v18  ;;  %960 = vmatpush1.bf16.msra.mxu1 %v1676_v19  ;;  %v1718_v49 = vld [vmem:[#allocation5 + $0x168] ss:$16 sps:$4 sm:$0xff]   ;;  %v72_v50 = vpack.c.bf16 %v68_v47, %v64_v46  ;;  %v1721_v52 = vld [vmem:[#allocation5 + $0x18c] ss:$16 sps:$4 sm:$0xff]   ;;  %v1731_v59 = vld [vmem:[#allocation5 + $0x1c4] ss:$16 sps:$4 sm:$0xff]   ;;  %p1942_p11 = scmp.lt.s32.totalorder %s1402_s11, %s1402_s11 }
  0x4b   :  { %875 = vmatprep.subr.bf16.mxu0 %v1677_v20  ;;  %961 = vmatprep.subr.bf16.mxu1 %v1679_v21  ;;  %v1724_v54 = vld [vmem:[#allocation5 + $0x188] ss:$16 sps:$4 sm:$0xff]   ;;  %v1727_v56 = vld [vmem:[#allocation5 + $0x1ac] ss:$16 sps:$4 sm:$0xff]   ;;  %v1735_v61 = vld [vmem:[#allocation5 + $0x1c0] ss:$16 sps:$4 sm:$0xff]  }
  0x4c   :  { %897 = vmatprep.mubr.bf16.mxu0 %v72_v50  ;;  %983 = vmatprep.mubr.bf16.mxu1 %v72_v50  ;;  %v1730_v58 = vld [vmem:[#allocation5 + $0x1a8] ss:$16 sps:$4 sm:$0xff]   ;;  %v1733_v60 = vld [vmem:[#allocation5 + $0x1cc] ss:$16 sps:$4 sm:$0xff]   ;;  %v1737_v63 = vld [vmem:[#allocation5 + $0x1e4] ss:$16 sps:$4 sm:$0xff]  }
  0x4d   :  { %v1736_v62 = vld [vmem:[#allocation5 + $0x1c8] ss:$16 sps:$4 sm:$0xff]   ;;  %v1739_v0 = vld [vmem:[#allocation5 + $0x1ec] ss:$16 sps:$4 sm:$0xff]   ;;  %v1741_v1 = vld [vmem:[#allocation5 + $0x1e0] ss:$16 sps:$4 sm:$0xff]  }
  0x4e   :  { %876 = vmatpush1.bf16.msra.mxu0 %v1681_v22  ;;  %962 = vmatpush1.bf16.msra.mxu1 %v1682_v23  ;;  %v1742_v2 = vld [vmem:[#allocation5 + $0x1e8] ss:$16 sps:$4 sm:$0xff]   ;;  %v1745_v3 = vld [vmem:[#allocation5 + $0x204] ss:$16 sps:$4 sm:$0xff]   ;;  %v1748_v6 = vld [vmem:[#allocation5 + $0x20c] ss:$16 sps:$4 sm:$0xff]  }
  0x4f   :  { %877 = vmatprep.subr.bf16.mxu0 %v1683_v24  ;;  %963 = vmatprep.subr.bf16.mxu1 %v1685_v25  ;;  %v63_v4 = vld [vmem:[#allocation2] sm:$0xff]  ;;  %v1746_v8 = vld [vmem:[#allocation5 + $0x208] ss:$16 sps:$4 sm:$0xff]   ;;  %v1754_v11 = vld [vmem:[#allocation5 + $0x22c] ss:$16 sps:$4 sm:$0xff]  }
  0x50   :  { %v67_v5 = vld [vmem:[#allocation2 + $0x20] sm:$0xff]  ;;  %v1752_v13 = vld [vmem:[#allocation5 + $0x228] ss:$16 sps:$4 sm:$0xff]   ;;  %v1760_v15 = vld [vmem:[#allocation5 + $0x24c] ss:$16 sps:$4 sm:$0xff]  }
  0x51   :  { %v1743_v7 = vld [vmem:[#allocation5 + $0x200] ss:$16 sps:$4 sm:$0xff]   ;;  %v71_v9 = vpack.c.bf16 %v67_v5, %v63_v4  ;;  %v1751_v10 = vld [vmem:[#allocation5 + $0x224] ss:$16 sps:$4 sm:$0xff]   ;;  %v1758_v17 = vld [vmem:[#allocation5 + $0x248] ss:$16 sps:$4 sm:$0xff]  }
  0x52   :  { %878 = vmatpush1.bf16.msra.mxu0 %v1687_v26  ;;  %964 = vmatpush1.bf16.msra.mxu1 %v1688_v27  ;;  %v1749_v12 = vld [vmem:[#allocation5 + $0x220] ss:$16 sps:$4 sm:$0xff]   ;;  %v1757_v14 = vld [vmem:[#allocation5 + $0x244] ss:$16 sps:$4 sm:$0xff]   ;;  %v1766_v19 = vld [vmem:[#allocation5 + $0x26c] ss:$16 sps:$4 sm:$0xff]  }
  0x53   :  { %879 = vmatprep.subr.bf16.mxu0 %v1689_v28  ;;  %965 = vmatprep.subr.bf16.mxu1 %v1691_v29  ;;  %v1755_v16 = vld [vmem:[#allocation5 + $0x240] ss:$16 sps:$4 sm:$0xff]   ;;  %v1763_v18 = vld [vmem:[#allocation5 + $0x264] ss:$16 sps:$4 sm:$0xff]   ;;  %v1764_v21 = vld [vmem:[#allocation5 + $0x268] ss:$16 sps:$4 sm:$0xff]  }
  0x54   :  { %v1761_v20 = vld [vmem:[#allocation5 + $0x260] ss:$16 sps:$4 sm:$0xff]   ;;  %v1769_v22 = vld [vmem:[#allocation5 + $0x284] ss:$16 sps:$4 sm:$0xff]   ;;  %v1772_v23 = vld [vmem:[#allocation5 + $0x28c] ss:$16 sps:$4 sm:$0xff]  }
  0x55   :  { %v1767_v24 = vld [vmem:[#allocation5 + $0x280] ss:$16 sps:$4 sm:$0xff]   ;;  %v1770_v25 = vld [vmem:[#allocation5 + $0x288] ss:$16 sps:$4 sm:$0xff]   ;;  %v1775_v26 = vld [vmem:[#allocation5 + $0x2a4] ss:$16 sps:$4 sm:$0xff]  }
  0x56   :  { %880 = vmatpush1.bf16.msra.mxu0 %v1693_v30  ;;  %966 = vmatpush1.bf16.msra.mxu1 %v1694_v31  ;;  %v1778_v27 = vld [vmem:[#allocation5 + $0x2ac] ss:$16 sps:$4 sm:$0xff]   ;;  %v1773_v28 = vld [vmem:[#allocation5 + $0x2a0] ss:$16 sps:$4 sm:$0xff]   ;;  %v1776_v29 = vld [vmem:[#allocation5 + $0x2a8] ss:$16 sps:$4 sm:$0xff]  }
  0x57   :  { %881 = vmatprep.subr.bf16.mxu0 %v1695_v32  ;;  %967 = vmatprep.subr.bf16.mxu1 %v1697_v33  ;;  %v1781_v30 = vld [vmem:[#allocation5 + $0x2c4] ss:$16 sps:$4 sm:$0xff]   ;;  %v1784_v31 = vld [vmem:[#allocation5 + $0x2cc] ss:$16 sps:$4 sm:$0xff]   ;;  %v1779_v33 = vld [vmem:[#allocation5 + $0x2c0] ss:$16 sps:$4 sm:$0xff]  }
  0x58   :  { %v66_v32 = vld [vmem:[#allocation2 + $0x18] sm:$0xff]  ;;  %v1797_v47 = vld [vmem:[#allocation5 + $0x320] ss:$16 sps:$4 sm:$0xff]   ;;  %v1835_v5 = vld [vmem:[#allocation5 + $0x3e4] ss:$16 sps:$4 sm:$0xff]  }
  0x59   :  { %v1802_v46 = vld [vmem:[#allocation5 + $0x32c] ss:$16 sps:$4 sm:$0xff]   ;;  %v1830_v4 = vld [vmem:[#allocation5 + $0x3c8] ss:$16 sps:$4 sm:$0xff]  }
  0x5a   :  { %882 = vmatpush1.bf16.msra.mxu0 %v1699_v34  ;;  %968 = vmatpush1.bf16.msra.mxu1 %v1700_v35  ;;  %v1782_v34 = vld [vmem:[#allocation5 + $0x2c8] ss:$16 sps:$4 sm:$0xff]   ;;  %v1808_v50 = vld [vmem:[#allocation5 + $0x34c] ss:$16 sps:$4 sm:$0xff]  }
  0x5b   :  { %883 = vmatprep.subr.bf16.mxu0 %v1701_v36  ;;  %969 = vmatprep.subr.bf16.mxu1 %v1703_v37  ;;  %v70_v35 = vld [vmem:[#allocation2 + $0x38] sm:$0xff]  ;;  %v1787_v36 = vld [vmem:[#allocation5 + $0x2e4] ss:$16 sps:$4 sm:$0xff]  }
  0x5c   :  { %v74_v37 = vpack.c.bf16 %v70_v35, %v66_v32  ;;  %v1859_v32 = vld [vmem:[#allocation7 + $0x68] sm:$0xff]  }
  0x5d   :  { %v1862_v35 = vld [vmem:[#allocation7 + $0xa8] sm:$0xff]  }
  0x5e   :  { %884 = vmatpush1.bf16.msra.mxu0 %v1705_v38  ;;  %970 = vmatpush1.bf16.msra.mxu1 %v1706_v39  ;;  %v1790_v38 = vld [vmem:[#allocation5 + $0x2ec] ss:$16 sps:$4 sm:$0xff]   ;;  %v1785_v39 = vld [vmem:[#allocation5 + $0x2e0] ss:$16 sps:$4 sm:$0xff]  }
  0x5f   :  { %885 = vmatprep.subr.bf16.mxu0 %v1707_v40  ;;  %971 = vmatprep.subr.bf16.mxu1 %v1709_v41  ;;  %v1788_v40 = vld [vmem:[#allocation5 + $0x2e8] ss:$16 sps:$4 sm:$0xff]   ;;  %v1793_v41 = vld [vmem:[#allocation5 + $0x304] ss:$16 sps:$4 sm:$0xff]  }
  0x62   :  { %886 = vmatpush1.bf16.msra.mxu0 %v1711_v42  ;;  %972 = vmatpush1.bf16.msra.mxu1 %v1712_v43  ;;  %v1796_v42 = vld [vmem:[#allocation5 + $0x30c] ss:$16 sps:$4 sm:$0xff]   ;;  %v1791_v43 = vld [vmem:[#allocation5 + $0x300] ss:$16 sps:$4 sm:$0xff]  }
  0x63   :  { %887 = vmatprep.subr.bf16.mxu0 %v1713_v44  ;;  %973 = vmatprep.subr.bf16.mxu1 %v1715_v45  ;;  %v1794_v44 = vld [vmem:[#allocation5 + $0x308] ss:$16 sps:$4 sm:$0xff]   ;;  %v1799_v45 = vld [vmem:[#allocation5 + $0x324] ss:$16 sps:$4 sm:$0xff]  }
  0x66   :  { %888 = vmatpush1.bf16.msra.mxu0 %v1717_v48  ;;  %974 = vmatpush1.bf16.msra.mxu1 %v1718_v49  ;;  %v1800_v48 = vld [vmem:[#allocation5 + $0x328] ss:$16 sps:$4 sm:$0xff]   ;;  %v1805_v49 = vld [vmem:[#allocation5 + $0x344] ss:$16 sps:$4 sm:$0xff]  }
  0x67   :  { %889 = vmatprep.subr.bf16.mxu0 %v1719_v51  ;;  %975 = vmatprep.subr.bf16.mxu1 %v1721_v52  ;;  %v1803_v51 = vld [vmem:[#allocation5 + $0x340] ss:$16 sps:$4 sm:$0xff]   ;;  %v1806_v52 = vld [vmem:[#allocation5 + $0x348] ss:$16 sps:$4 sm:$0xff]  }
  0x6a   :  { %890 = vmatpush1.bf16.msra.mxu0 %v1723_v53  ;;  %976 = vmatpush1.bf16.msra.mxu1 %v1724_v54  ;;  %v1811_v53 = vld [vmem:[#allocation5 + $0x364] ss:$16 sps:$4 sm:$0xff]   ;;  %v1814_v54 = vld [vmem:[#allocation5 + $0x36c] ss:$16 sps:$4 sm:$0xff]  }
  0x6b   :  { %891 = vmatprep.subr.bf16.mxu0 %v1725_v55  ;;  %977 = vmatprep.subr.bf16.mxu1 %v1727_v56  ;;  %v1809_v55 = vld [vmem:[#allocation5 + $0x360] ss:$16 sps:$4 sm:$0xff]   ;;  %v1812_v56 = vld [vmem:[#allocation5 + $0x368] ss:$16 sps:$4 sm:$0xff]  }
  0x6e   :  { %892 = vmatpush1.bf16.msra.mxu0 %v1729_v57  ;;  %978 = vmatpush1.bf16.msra.mxu1 %v1730_v58  ;;  %v1817_v57 = vld [vmem:[#allocation5 + $0x384] ss:$16 sps:$4 sm:$0xff]   ;;  %v1820_v58 = vld [vmem:[#allocation5 + $0x38c] ss:$16 sps:$4 sm:$0xff]  }
  0x6f   :  { %893 = vmatprep.subr.bf16.mxu0 %v1731_v59  ;;  %979 = vmatprep.subr.bf16.mxu1 %v1733_v60  ;;  %v1815_v59 = vld [vmem:[#allocation5 + $0x380] ss:$16 sps:$4 sm:$0xff]   ;;  %v1818_v60 = vld [vmem:[#allocation5 + $0x388] ss:$16 sps:$4 sm:$0xff]  }
  0x72   :  { %894 = vmatpush1.bf16.msra.mxu0 %v1735_v61  ;;  %980 = vmatpush1.bf16.msra.mxu1 %v1736_v62  ;;  %v1823_v61 = vld [vmem:[#allocation5 + $0x3a4] ss:$16 sps:$4 sm:$0xff]   ;;  %v1826_v62 = vld [vmem:[#allocation5 + $0x3ac] ss:$16 sps:$4 sm:$0xff]  }
  0x73   :  { %895 = vmatprep.subr.bf16.mxu0 %v1737_v63  ;;  %981 = vmatprep.subr.bf16.mxu1 %v1739_v0  ;;  %v1821_v63 = vld [vmem:[#allocation5 + $0x3a0] ss:$16 sps:$4 sm:$0xff]   ;;  %v1824_v0 = vld [vmem:[#allocation5 + $0x3a8] ss:$16 sps:$4 sm:$0xff]  }
  0x76   :  { %896 = vmatpush1.bf16.msra.mxu0 %v1741_v1  ;;  %982 = vmatpush1.bf16.msra.mxu1 %v1742_v2  ;;  %v1829_v1 = vld [vmem:[#allocation5 + $0x3c4] ss:$16 sps:$4 sm:$0xff]   ;;  %v1832_v2 = vld [vmem:[#allocation5 + $0x3cc] ss:$16 sps:$4 sm:$0xff]  }
  0x77   :  { %908 = vmatprep.subr.bf16.mxu0 %v1745_v3  ;;  %994 = vmatprep.subr.bf16.mxu1 %v1748_v6  ;;  %v1827_v3 = vld [vmem:[#allocation5 + $0x3c0] ss:$16 sps:$4 sm:$0xff]   ;;  %v1838_v6 = vld [vmem:[#allocation5 + $0x3ec] ss:$16 sps:$4 sm:$0xff]  }
  0x79   :  { %898 = vmatmul.mubr.bf16.vlgmr.msra.gmra.mrb[0].mxu0 %v71_v9  ;;  %984 = vmatmul.mubr.bf16.vlgmr.msra.gmra.mrb[0].mxu1 %v71_v9  ;;  %v65_v9 = vld [vmem:[#allocation2 + $0x10] sm:$0xff] }
  0x7a   :  { %909 = vmatpush1.bf16.msra.mxu0 %v1743_v7  ;;  %995 = vmatpush1.bf16.msra.mxu1 %v1746_v8  ;;  %v1833_v7 = vld [vmem:[#allocation5 + $0x3e0] ss:$16 sps:$4 sm:$0xff]   ;;  %v1836_v8 = vld [vmem:[#allocation5 + $0x3e8] ss:$16 sps:$4 sm:$0xff]  }
  0x7b   :  { %910 = vmatprep.subr.bf16.mxu0 %v1751_v10  ;;  %996 = vmatprep.subr.bf16.mxu1 %v1754_v11  ;;  %v69_v10 = vld [vmem:[#allocation2 + $0x30] sm:$0xff]  ;;  %v1839_v11 = vld [vmem:[#allocation7 + $0x40] sm:$0xff]  }
  0x7c   :  { %940 = vmatprep.mubr.bf16.mxu0 %v74_v37  ;;  %1026 = vmatprep.mubr.bf16.mxu1 %v74_v37  ;;  %v1864_v37 = vld [vmem:[#allocation7 + $0xf0] sm:$0xff]  }
  0x7e   :  { %911 = vmatpush1.bf16.msra.mxu0 %v1749_v12  ;;  %997 = vmatpush1.bf16.msra.mxu1 %v1752_v13  ;;  %v1840_v12 = vld [vmem:[#allocation7 + $0xc0] sm:$0xff]   ;;  %v73_v13 = vpack.c.bf16 %v69_v10, %v65_v9 }
  0x7f   :  { %912 = vmatprep.subr.bf16.mxu0 %v1757_v14  ;;  %998 = vmatprep.subr.bf16.mxu1 %v1760_v15  ;;  %v1841_v14 = vld [vmem:[#allocation7] sm:$0xff]  }
  0x80   :  { %v1842_v15 = vld [vmem:[#allocation7 + $0x80] sm:$0xff]  }
  0x82   :  { %913 = vmatpush1.bf16.msra.mxu0 %v1755_v16  ;;  %999 = vmatpush1.bf16.msra.mxu1 %v1758_v17  ;;  %v1843_v16 = vld [vmem:[#allocation7 + $0x48] sm:$0xff]  }
  0x83   :  { %914 = vmatprep.subr.bf16.mxu0 %v1763_v18  ;;  %1000 = vmatprep.subr.bf16.mxu1 %v1766_v19  ;;  %v1844_v17 = vld [vmem:[#allocation7 + $0xc8] sm:$0xff]  }
  0x84   :  { %v1845_v18 = vld [vmem:[#allocation7 + $0x8] sm:$0xff]  }
  0x85   :  { %v1846_v19 = vld [vmem:[#allocation7 + $0x88] sm:$0xff]  }
  0x86   :  { %915 = vmatpush1.bf16.msra.mxu0 %v1761_v20  ;;  %1001 = vmatpush1.bf16.msra.mxu1 %v1764_v21  ;;  %v1847_v20 = vld [vmem:[#allocation7 + $0x50] sm:$0xff]  }
  0x87   :  { %916 = vmatprep.subr.bf16.mxu0 %v1769_v22  ;;  %1002 = vmatprep.subr.bf16.mxu1 %v1772_v23  ;;  %v1848_v21 = vld [vmem:[#allocation7 + $0xd0] sm:$0xff]  }
  0x88   :  { %v1849_v22 = vld [vmem:[#allocation7 + $0x10] sm:$0xff]  }
  0x89   :  { %v1850_v23 = vld [vmem:[#allocation7 + $0x90] sm:$0xff]  }
  0x8a   :  { %917 = vmatpush1.bf16.msra.mxu0 %v1767_v24  ;;  %1003 = vmatpush1.bf16.msra.mxu1 %v1770_v25  ;;  %v1851_v24 = vld [vmem:[#allocation7 + $0x58] sm:$0xff]  }
  0x8b   :  { %918 = vmatprep.subr.bf16.mxu0 %v1775_v26  ;;  %1004 = vmatprep.subr.bf16.mxu1 %v1778_v27  ;;  %v1852_v25 = vld [vmem:[#allocation7 + $0xd8] sm:$0xff]  }
  0x8c   :  { %v1853_v26 = vld [vmem:[#allocation7 + $0x18] sm:$0xff]  }
  0x8d   :  { %v1854_v27 = vld [vmem:[#allocation7 + $0x98] sm:$0xff]  }
  0x8e   :  { %919 = vmatpush1.bf16.msra.mxu0 %v1773_v28  ;;  %1005 = vmatpush1.bf16.msra.mxu1 %v1776_v29  ;;  %v1855_v28 = vld [vmem:[#allocation7 + $0x60] sm:$0xff]  }
  0x8f   :  { %920 = vmatprep.subr.bf16.mxu0 %v1781_v30  ;;  %1006 = vmatprep.subr.bf16.mxu1 %v1784_v31  ;;  %v1856_v29 = vld [vmem:[#allocation7 + $0xe0] sm:$0xff]  }
  0x90   :  { %v1857_v30 = vld [vmem:[#allocation7 + $0x20] sm:$0xff]  }
  0x91   :  { %v1858_v31 = vld [vmem:[#allocation7 + $0xa0] sm:$0xff]  }
  0x92   :  { %921 = vmatpush1.bf16.msra.mxu0 %v1779_v33  ;;  %1007 = vmatpush1.bf16.msra.mxu1 %v1782_v34  ;;  %v1860_v33 = vld [vmem:[#allocation7 + $0xe8] sm:$0xff]  }
  0x93   :  { %922 = vmatprep.subr.bf16.mxu0 %v1787_v36  ;;  %1008 = vmatprep.subr.bf16.mxu1 %v1790_v38  ;;  %v1861_v34 = vld [vmem:[#allocation7 + $0x28] sm:$0xff]   ;;  %v1863_v36 = vld [vmem:[#allocation7 + $0x70] sm:$0xff]  }
  0x94   :  { %v1865_v38 = vld [vmem:[#allocation7 + $0x30] sm:$0xff]  }
  0x96   :  { %923 = vmatpush1.bf16.msra.mxu0 %v1785_v39  ;;  %1009 = vmatpush1.bf16.msra.mxu1 %v1788_v40  ;;  %v1866_v39 = vld [vmem:[#allocation7 + $0xb0] sm:$0xff]   ;;  %v1867_v40 = vld [vmem:[#allocation7 + $0x78] sm:$0xff]  }
  0x97   :  { %924 = vmatprep.subr.bf16.mxu0 %v1793_v41  ;;  %1010 = vmatprep.subr.bf16.mxu1 %v1796_v42  ;;  %v1868_v41 = vld [vmem:[#allocation7 + $0xf8] sm:$0xff]  }
  0x98   :  { %v1869_v42 = vld [vmem:[#allocation7 + $0x38] sm:$0xff]  }
  0x9a   :  { %925 = vmatpush1.bf16.msra.mxu0 %v1791_v43  ;;  %1011 = vmatpush1.bf16.msra.mxu1 %v1794_v44  ;;  %v1870_v43 = vld [vmem:[#allocation7 + $0xb8] sm:$0xff]   ;;  %v205_v44 = vlaneseq }
  0x9b   :  { %926 = vmatprep.subr.bf16.mxu0 %v1799_v45  ;;  %1012 = vmatprep.subr.bf16.mxu1 %v1802_v46 }
  0x9c   :  { %v206_v45 = vshrl.u32 %v205_v44, 7 }
  0x9e   :  { %927 = vmatpush1.bf16.msra.mxu0 %v1797_v47  ;;  %1013 = vmatpush1.bf16.msra.mxu1 %v1800_v48  ;;  %v207_v46 = vsub.s32 0, %v206_v45  ;;  %v215_v47 = vsub.s32 2, %v206_v45  ;;  %v203_v48 = vld [vmem:[%s2063_s2] sm:$0xf] }
  0x9f   :  { %928 = vmatprep.subr.bf16.mxu0 %v1805_v49  ;;  %1014 = vmatprep.subr.bf16.mxu1 %v1808_v50  ;;  %v211_v49 = vsub.s32 1, %v206_v45  ;;  %v219_v50 = vsub.s32 3, %v206_v45 }
  0xa2   :  { %929 = vmatpush1.bf16.msra.mxu0 %v1803_v51  ;;  %1015 = vmatpush1.bf16.msra.mxu1 %v1806_v52  ;;  %v208_v51 = vrot.slane %v203_v48, %v207_v46  ;;  %v216_v52 = vrot.slane %v203_v48, %v215_v47 }
  0xa3   :  { %930 = vmatprep.subr.bf16.mxu0 %v1811_v53  ;;  %1016 = vmatprep.subr.bf16.mxu1 %v1814_v54  ;;  %v212_v53 = vrot.slane %v203_v48, %v211_v49  ;;  %v220_v54 = vrot.slane %v203_v48, %v219_v50 }
  0xa6   :  { %931 = vmatpush1.bf16.msra.mxu0 %v1809_v55  ;;  %1017 = vmatpush1.bf16.msra.mxu1 %v1812_v56 }
  0xa7   :  { %932 = vmatprep.subr.bf16.mxu0 %v1817_v57  ;;  %1018 = vmatprep.subr.bf16.mxu1 %v1820_v58 }
  0xaa   :  { %933 = vmatpush1.bf16.msra.mxu0 %v1815_v59  ;;  %1019 = vmatpush1.bf16.msra.mxu1 %v1818_v60 }
  0xab   :  { %934 = vmatprep.subr.bf16.mxu0 %v1823_v61  ;;  %1020 = vmatprep.subr.bf16.mxu1 %v1826_v62 }
  0xae   :  { %935 = vmatpush1.bf16.msra.mxu0 %v1821_v63  ;;  %1021 = vmatpush1.bf16.msra.mxu1 %v1824_v0 }
  0xaf   :  { %936 = vmatprep.subr.bf16.mxu0 %v1829_v1  ;;  %1022 = vmatprep.subr.bf16.mxu1 %v1832_v2 }
  0xb2   :  { %937 = vmatpush1.bf16.msra.mxu0 %v1827_v3  ;;  %1023 = vmatpush1.bf16.msra.mxu1 %v1830_v4 }
  0xb3   :  { %938 = vmatprep.subr.bf16.mxu0 %v1835_v5  ;;  %1024 = vmatprep.subr.bf16.mxu1 %v1838_v6 }
  0xb6   :  { %939 = vmatpush1.bf16.msra.mxu0 %v1833_v7  ;;  %1025 = vmatpush1.bf16.msra.mxu1 %v1836_v8 }
  0xb7   :  { %1575 = vmatprep.subr.bf16.mxu0 %v1839_v11  ;;  %1597 = vmatprep.subr.bf16.mxu1 %v1840_v12 }
  0xb9   :  { %941 = vmatmul.mubr.bf16.vlgmr.msra.gmra.mrb[0].mxu0 %v73_v13  ;;  %1027 = vmatmul.mubr.bf16.vlgmr.msra.gmra.mrb[0].mxu1 %v73_v13 }
  0xba   :  { %1576 = vmatpush3.bf16.msra.mxu0 %v1841_v14  ;;  %1598 = vmatpush3.bf16.msra.mxu1 %v1842_v15 }
  0xbb   :  { %1577 = vmatprep.subr.bf16.mxu0 %v1843_v16  ;;  %1599 = vmatprep.subr.bf16.mxu1 %v1844_v17 }
  0xbe   :  { %1578 = vmatpush3.bf16.msra.mxu0 %v1845_v18  ;;  %1600 = vmatpush3.bf16.msra.mxu1 %v1846_v19 }
  0xbf   :  { %1579 = vmatprep.subr.bf16.mxu0 %v1847_v20  ;;  %1601 = vmatprep.subr.bf16.mxu1 %v1848_v21  ;;  %v1542_v21 = vld [vmem:[%s2065_s4] ss:$0 sm:$0xff]  ;;  %s1937_s4 = scalar_lea.vmem %s1402_s11, 256 }
  0xc0   :  { %p1938_p10 = scmp.ne.s32.totalorder %s1402_s11, %s1937_s4  ;;  %p1943_p12 = scmp.lt.s32.totalorder %s1937_s4, %s1937_s4 }
  0xc2   :  { %1580 = vmatpush3.bf16.msra.mxu0 %v1849_v22  ;;  %1602 = vmatpush3.bf16.msra.mxu1 %v1850_v23  ;;  %p1944_p13 = por %p1943_p12, %p1942_p11 }
  0xc3   :  { %1581 = vmatprep.subr.bf16.mxu0 %v1851_v24  ;;  %1603 = vmatprep.subr.bf16.mxu1 %v1852_v25 }
  0xc4   :  { %p1945_p0 = pnand %p1944_p13, %p1938_p10 }
  0xc6   :  { %1582 = vmatpush3.bf16.msra.mxu0 %v1853_v26  ;;  %1604 = vmatpush3.bf16.msra.mxu1 %v1854_v27 }
  0xc7   :  { %1583 = vmatprep.subr.bf16.mxu0 %v1855_v28  ;;  %1605 = vmatprep.subr.bf16.mxu1 %v1856_v29 }
  0xca   :  { %1584 = vmatpush3.bf16.msra.mxu0 %v1857_v30  ;;  %1606 = vmatpush3.bf16.msra.mxu1 %v1858_v31 }
  0xcb   :  { %1585 = vmatprep.subr.bf16.mxu0 %v1859_v32  ;;  %1607 = vmatprep.subr.bf16.mxu1 %v1860_v33 }
  0xce   :  { %1586 = vmatpush3.bf16.msra.mxu0 %v1861_v34  ;;  %1608 = vmatpush3.bf16.msra.mxu1 %v1862_v35 }
  0xcf   :  { %1587 = vmatprep.subr.bf16.mxu0 %v1863_v36  ;;  %1609 = vmatprep.subr.bf16.mxu1 %v1864_v37 }
  0xd2   :  { %1588 = vmatpush3.bf16.msra.mxu0 %v1865_v38  ;;  %1610 = vmatpush3.bf16.msra.mxu1 %v1866_v39 }
  0xd3   :  { %1589 = vmatprep.subr.bf16.mxu0 %v1867_v40  ;;  %1611 = vmatprep.subr.bf16.mxu1 %v1868_v41 }
  0xd6   :  { %1590 = vmatpush3.bf16.msra.mxu0 %v1869_v42  ;;  %1612 = vmatpush3.bf16.msra.mxu1 %v1870_v43 }
 0x18c   :  { %v942_v55 = vpop.f32.mrb[0].mxu0  ;;  %v1028_v56 = vpop.f32.mrb[0].mxu1 }
 0x18d   :  { %v1619_v57 = vadd.f32 %v942_v55, %v208_v51  ;;  %v1623_v58 = vadd.f32 %v1028_v56, %v216_v52  ;;  %v944_v59 = vpop.f32.mrb[1].mxu0  ;;  %v1030_v60 = vpop.f32.mrb[1].mxu1 }
 0x18e   :  { %v1620_v61 = vadd.f32 %v944_v59, %v212_v53  ;;  %v1624_v62 = vadd.f32 %v1030_v60, %v220_v54  ;;  %v946_v63 = vpop.f32.mrb[2].mxu0  ;;  %v1032_v0 = vpop.f32.mrb[2].mxu1 }
 0x18f   :  { %v1621_v1 = vadd.f32 %v946_v63, %v208_v51  ;;  %v1625_v2 = vadd.f32 %v1032_v0, %v216_v52  ;;  %v948_v3 = vpop.f32.mrb[3].mxu0  ;;  %v1034_v4 = vpop.f32.mrb[3].mxu1  ;;  %v1037_v7 = vmax.f32 %v1619_v57, 0.0  ;;  %v1039_v8 = vmax.f32 %v1623_v58, 0.0 }
 0x190   :  { %v1622_v5 = vadd.f32 %v948_v3, %v212_v53  ;;  %v1626_v6 = vadd.f32 %v1034_v4, %v220_v54  ;;  %v1038_v11 = vmax.f32 %v1620_v61, 0.0  ;;  %v1040_v12 = vmax.f32 %v1624_v62, 0.0 }
 0x191   :  { %v1041_v9 = vmax.f32 %v1621_v1, 0.0  ;;  %v1043_v10 = vmax.f32 %v1625_v2, 0.0 }
 0x192   :  { %v1042_v13 = vmax.f32 %v1622_v5, 0.0  ;;  %v1044_v14 = vmax.f32 %v1626_v6, 0.0 }
 0x193   :  { %v1045_v15 = vpack.c.bf16 %v1041_v9, %v1037_v7  ;;  %v1047_v16 = vpack.c.bf16 %v1043_v10, %v1039_v8 }
 0x194   :  { %v1046_v17 = vpack.c.bf16 %v1042_v13, %v1038_v11  ;;  %v1048_v18 = vpack.c.bf16 %v1044_v14, %v1040_v12 }
 0x196   :  { %1344 = vmatprep.mubr.bf16.mxu0 %v1046_v17  ;;  %1385 = vmatprep.mubr.bf16.mxu1 %v1048_v18 }
 0x197   :  { %1345 = vmatmul.mubr.bf16.vlgmr.msra.gmra.mrb[4].mxu0 %v1045_v15  ;;  %1386 = vmatmul.mubr.bf16.vlgmr.msra.gmra.mrb[4].mxu1 %v1047_v16 }
 0x26a   :  { %v1591_v19 = vpop.f32.mrb[4].mxu0  ;;  %v1613_v20 = vpop.f32.mrb[4].mxu1 }
 0x26b   :  { %v1592_v22 = vpop.f32.mrb[5].mxu0  ;;  %v1614_v23 = vpop.f32.mrb[5].mxu1 }
 0x26c   :  { %v1593_v24 = vadd.f32 %v1592_v22, %v1591_v19  ;;  %v1615_v25 = vadd.f32 %v1614_v23, %v1613_v20  ;;  %v1594_v26 = vpop.f32.mrb[6].mxu0  ;;  %v1616_v27 = vpop.f32.mrb[6].mxu1 }
 0x26d   :  { %v1595_v28 = vpop.f32.mrb[7].mxu0  ;;  %v1617_v29 = vpop.f32.mrb[7].mxu1 }
 0x26e   :  { %v1347_v30 = vadd.f32 %v1593_v24, %v1542_v21  ;;  %v1596_v31 = vadd.f32 %v1595_v28, %v1594_v26  ;;  %v1618_v32 = vadd.f32 %v1617_v29, %v1616_v27 }
 0x270   :  { %v1388_v33 = vadd.f32 %v1615_v25, %v1347_v30  ;;  %v1350_v34 = vadd.f32 %v1596_v31, %v1542_v21 }
 0x272   :  { %1394 = vst [vmem:[#allocation8] sm:$0xff] %v1388_v33  ;;  %v1391_v35 = vadd.f32 %v1618_v32, %v1350_v34 }
 0x274   :  { %1395 = vst [vmem:[#allocation8 + $0x8] sm:$0xff] %v1391_v35 }
 0x275   :  { %1948 = shalt.err (!%p1945_p0)
}
 0x276   :  { %s1949_s14 = scalar_lea.hbm %s2066_s5, 256 }
 0x277   :  { %p1950_p1 = scmp.ne.s32.totalorder %s2066_s5, %s1949_s14  ;;  %p1953_p2 = scmp.lt.u32.totalorder %s1949_s14, %s2066_s5 }
 0x279   :  { %p1955_p3 = pnand %p1953_p2, %p1950_p1 }
 0x27b   :  { %1958 = shalt.err (!%p1955_p3)
}
 0x27c   :  { %s1975_s18 = smov 128   ;;  %s1976_s19 = smov 8  }
 0x27d   :  { %1407 = dma.vmem_to_hbm [thread:$0]  %s1402_s11, 256, %s2066_s5, [#allocation4], %s1975_s18, %s1975_s18, %s1976_s19  }
 0x27e   :  { %1963 = dma.done.wait [#allocation4], 256  }
 0x27f   :  { %1964 = vsyncadd [#allocation4], 4294967040 }
 0x280   :  { %1411 = vsyncpa [#allocation3], 1 }
 0x281   :  { %1412 = vsyncpa [#allocation6], 1 }
 0x282   :  { %1413 = vsyncpa [#allocation4], 1 }

</bundles_post_ra>
